<compile_context>
chip_gen: v5e
topology: v5e:2x2
jax: 0.10.0
libtpu: 0.0.40
codegen_flags: <defaults>
</compile_context>

<pallas_src>
import functools

import jax
import jax.numpy as jnp
from jax.experimental import pallas as pl
from jax.experimental.pallas import tpu as pltpu


def _round_up(x, m):
    return (x + m - 1) // m * m


def _pad2(x, rows, cols):
    return jnp.pad(x, ((0, rows - x.shape[0]), (0, cols - x.shape[1])))


# ---------------------------------------------------------------------------
# SAGEConv ('mean') kernel, tiled:
#   grid = (dst tiles [parallel], src reduction tiles [arbitrary])
#   acc  += A_tile @ X_tile          (bf16 MXU, f32 accumulate)
#   deg  += row_sum(A_tile)
#   finalize: out = (acc / max(deg,1)) @ W_neigh + X_dst @ W_self + bias [+ReLU]
# ---------------------------------------------------------------------------
def sage_conv_kernel(a_ref, x_ref, xdst_ref, wn_ref, ws_ref, b_ref, o_ref,
                     acc_ref, deg_ref, *, apply_relu):
    k = pl.program_id(1)
    nk = pl.num_programs(1)

    @pl.when(k == 0)
    def _():
        acc_ref[...] = jnp.zeros_like(acc_ref)
        deg_ref[...] = jnp.zeros_like(deg_ref)

    a = a_ref[...]                                               # bf16 (tm, tk)
    acc_ref[...] += jnp.dot(a, x_ref[...],
                            preferred_element_type=jnp.float32)  # MXU bf16
    deg_ref[...] += jnp.sum(a.astype(jnp.float32), axis=-1, keepdims=True)

    @pl.when(k == nk - 1)
    def _():
        inv = 1.0 / jnp.maximum(deg_ref[...], 1.0)               # exact, (tm,1)
        agg = acc_ref[...] * inv                                 # 'mean' aggregator
        out = jnp.dot(agg, wn_ref[...], preferred_element_type=jnp.float32)
        out = out + jnp.dot(xdst_ref[...].astype(jnp.float32), ws_ref[...],
                            preferred_element_type=jnp.float32)
        out = out + b_ref[...]
        if apply_relu:
            out = jnp.maximum(out, 0.0)
        o_ref[...] = out


def sage_conv(a, x, w_neigh, w_self, bias, apply_relu, *, tm=256, tk=1024):
    n_dst, n_src = a.shape
    f = x.shape[1]
    h = w_neigh.shape[1]

    tm = min(tm, _round_up(n_dst, 16))          # sublane dim (bf16-tile friendly)
    tk = min(tk, _round_up(n_src, 128))         # lane dim of A tile
    f_pad = _round_up(f, 128)
    h_pad = _round_up(h, 128)
    n_dst_pad = _round_up(n_dst, tm)
    n_src_pad = _round_up(max(n_src, n_dst_pad), tk)

    a_p = _pad2(a, n_dst_pad, n_src_pad).astype(jnp.bfloat16)
    x_p = _pad2(x, n_src_pad, f_pad).astype(jnp.bfloat16)
    wn_p = _pad2(w_neigh, f_pad, h_pad).astype(jnp.float32)
    ws_p = _pad2(w_self, f_pad, h_pad).astype(jnp.float32)
    b_p = _pad2(bias, 1, h_pad).astype(jnp.float32)

    grid = (n_dst_pad // tm, n_src_pad // tk)
    kernel = functools.partial(sage_conv_kernel, apply_relu=apply_relu)

    flops = 2 * n_dst_pad * n_src_pad * f_pad + 4 * n_dst_pad * f_pad * h_pad
    bytes_accessed = (a_p.size * 2 + x_p.size * 2 + n_dst_pad * f_pad * 2
                      + (wn_p.size + ws_p.size + b_p.size) * 4
                      + n_dst_pad * h_pad * 4)

    out = pl.pallas_call(
        kernel,
        out_shape=jax.ShapeDtypeStruct((n_dst_pad, h_pad), jnp.float32),
        grid_spec=pltpu.PrefetchScalarGridSpec(
            num_scalar_prefetch=0,
            grid=grid,
            in_specs=[
                pl.BlockSpec((tm, tk), lambda i, k: (i, k)),         # A tile
                pl.BlockSpec((tk, f_pad), lambda i, k: (k, 0)),      # X (src tiles)
                pl.BlockSpec((tm, f_pad), lambda i, k: (i, 0)),      # X (dst view)
                pl.BlockSpec((f_pad, h_pad), lambda i, k: (0, 0)),   # W_neigh
                pl.BlockSpec((f_pad, h_pad), lambda i, k: (0, 0)),   # W_self
                pl.BlockSpec((1, h_pad), lambda i, k: (0, 0)),       # bias
            ],
            out_specs=pl.BlockSpec((tm, h_pad), lambda i, k: (i, 0)),
            scratch_shapes=[pltpu.VMEM((tm, f_pad), jnp.float32),    # agg acc
                            pltpu.VMEM((tm, 1), jnp.float32)]),      # degree acc
        compiler_params=pltpu.CompilerParams(
            dimension_semantics=("parallel", "arbitrary"),
            vmem_limit_bytes=32 * 1024 * 1024),
        cost_estimate=pl.CostEstimate(flops=flops, transcendentals=0,
                                      bytes_accessed=bytes_accessed),
    )(a_p, x_p, x_p, wn_p, ws_p, b_p)
    return out[:n_dst, :h]


# ---------------------------------------------------------------------------
# Edge predictor kernel (single merged call for pos+neg edges):
#   Linear(2H->H) + ReLU + Linear(H->H) + ReLU + Linear(H->1)
# concat([src, dst]) @ W1 is fused as src @ W1_src + dst @ W1_dst.
# Final score is written into a lane-dense (te, 128) slab.
# ---------------------------------------------------------------------------
def predictor_kernel(s_ref, d_ref, w1s_ref, w1d_ref, b1_ref, w2_ref, b2_ref,
                     w3_ref, b3_ref, o_ref):
    h = (jnp.dot(s_ref[...], w1s_ref[...], preferred_element_type=jnp.float32)
         + jnp.dot(d_ref[...], w1d_ref[...], preferred_element_type=jnp.float32)
         + b1_ref[...])
    h = jnp.maximum(h, 0.0)
    h = jnp.dot(h, w2_ref[...], preferred_element_type=jnp.float32) + b2_ref[...]
    h = jnp.maximum(h, 0.0)
    o_ref[...] = (jnp.dot(h, w3_ref[...], preferred_element_type=jnp.float32)
                  + b3_ref[...])


def predictor(src_emb, dst_emb, p, *, te=256):
    e, h = src_emb.shape
    h_pad = _round_up(h, 128)
    te = min(te, _round_up(e, 8))
    e_pad = _round_up(e, te)

    s_p = _pad2(src_emb, e_pad, h_pad).astype(jnp.float32)
    d_p = _pad2(dst_emb, e_pad, h_pad).astype(jnp.float32)
    w1s = _pad2(p["w1_src"], h_pad, h_pad)
    w1d = _pad2(p["w1_dst"], h_pad, h_pad)
    b1 = _pad2(p["b1"], 1, h_pad)
    w2 = _pad2(p["w2"], h_pad, h_pad)
    b2 = _pad2(p["b2"], 1, h_pad)
    w3 = _pad2(p["w3"], h_pad, 128)         # lane-dense output slab (col 0 real)
    b3 = _pad2(p["b3"], 1, 128)

    out = pl.pallas_call(
        predictor_kernel,
        out_shape=jax.ShapeDtypeStruct((e_pad, 128), jnp.float32),
        grid_spec=pltpu.PrefetchScalarGridSpec(
            num_scalar_prefetch=0,
            grid=(e_pad // te,),
            in_specs=[
                pl.BlockSpec((te, h_pad), lambda i: (i, 0)),
                pl.BlockSpec((te, h_pad), lambda i: (i, 0)),
                pl.BlockSpec((h_pad, h_pad), lambda i: (0, 0)),
                pl.BlockSpec((h_pad, h_pad), lambda i: (0, 0)),
                pl.BlockSpec((1, h_pad), lambda i: (0, 0)),
                pl.BlockSpec((h_pad, h_pad), lambda i: (0, 0)),
                pl.BlockSpec((1, h_pad), lambda i: (0, 0)),
                pl.BlockSpec((h_pad, 128), lambda i: (0, 0)),
                pl.BlockSpec((1, 128), lambda i: (0, 0)),
            ],
            out_specs=pl.BlockSpec((te, 128), lambda i: (i, 0))),
        compiler_params=pltpu.CompilerParams(
            dimension_semantics=("parallel",),
            vmem_limit_bytes=32 * 1024 * 1024),
    )(s_p, d_p, w1s, w1d, b1, w2, b2, w3, b3)
    return out[:e, :1]


# ---------------------------------------------------------------------------
# Model: parameters + forward (matches torch Model.forward semantics).
# ---------------------------------------------------------------------------
def init_params(key, in_feats, n_hidden):
    ks = jax.random.split(key, 10)
    s = lambda k, shp, fan_in: (jax.random.normal(k, shp, jnp.float32)
                                / jnp.sqrt(jnp.float32(fan_in)))
    return {
        "conv1": {"w_neigh": s(ks[0], (in_feats, n_hidden), in_feats),
                  "w_self":  s(ks[1], (in_feats, n_hidden), in_feats),
                  "bias":    jnp.zeros((1, n_hidden), jnp.float32)},
        "conv2": {"w_neigh": s(ks[2], (n_hidden, n_hidden), n_hidden),
                  "w_self":  s(ks[3], (n_hidden, n_hidden), n_hidden),
                  "bias":    jnp.zeros((1, n_hidden), jnp.float32)},
        "pred": {"w1_src": s(ks[4], (n_hidden, n_hidden), 2 * n_hidden),
                 "w1_dst": s(ks[5], (n_hidden, n_hidden), 2 * n_hidden),
                 "b1":     jnp.zeros((1, n_hidden), jnp.float32),
                 "w2":     s(ks[6], (n_hidden, n_hidden), n_hidden),
                 "b2":     jnp.zeros((1, n_hidden), jnp.float32),
                 "w3":     s(ks[7], (n_hidden, 1), n_hidden),
                 "b3":     jnp.zeros((1, 1), jnp.float32)},
    }


def model_forward(params, blocks, input_feat, pos_edges, neg_edges):
    a0, a1 = blocks                      # [n1, n0], [n2, n1] dense block adjacency
    c1, c2 = params["conv1"], params["conv2"]
    # conv1 + ReLU  (DGL block convention: dst nodes are the first n1 src nodes;
    # the self-term slice is taken inside the kernel via a dst-aligned BlockSpec)
    h1 = sage_conv(a0, input_feat, c1["w_neigh"], c1["w_self"], c1["bias"],
                   apply_relu=True)
    # conv2
    h2 = sage_conv(a1, h1, c2["w_neigh"], c2["w_self"], c2["bias"],
                   apply_relu=False)
    # Edge gathers are graph glue, done in plain JAX; pos+neg merged into ONE
    # predictor call (weights DMA'd once, single launch).
    # TODO(synk): for large edge counts, fuse the h2[src]/h2[dst] gathers into the
    # predictor via PrefetchScalarGridSpec + pl.Element row blocks.
    pos_src, pos_dst = pos_edges
    neg_src, neg_dst = neg_edges
    n_pos = pos_src.shape[0]
    src_all = jnp.concatenate([h2[pos_src], h2[neg_src]], axis=0)
    dst_all = jnp.concatenate([h2[pos_dst], h2[neg_dst]], axis=0)
    scores = predictor(src_all, dst_all, params["pred"])
    return scores[:n_pos], scores[n_pos:]


# ---------------------------------------------------------------------------
# Pure-JAX reference for correctness checking (applies the same bf16 input
# rounding as the kernels, with f32 math).
# ---------------------------------------------------------------------------
def _ref_sage(a, x, w_n, w_s, b, relu):
    n_dst = a.shape[0]
    a32 = a.astype(jnp.bfloat16).astype(jnp.float32)
    x32 = x.astype(jnp.bfloat16).astype(jnp.float32)
    deg = jnp.sum(a32, axis=-1, keepdims=True)
    agg = (a32 @ x32) * (1.0 / jnp.maximum(deg, 1.0))
    out = agg @ w_n + x32[:n_dst] @ w_s + b
    return jnp.maximum(out, 0.0) if relu else out


def _ref_pred(s, d, p):
    h = jnp.maximum(s @ p["w1_src"] + d @ p["w1_dst"] + p["b1"], 0.0)
    h = jnp.maximum(h @ p["w2"] + p["b2"], 0.0)
    return h @ p["w3"] + p["b3"]


def _ref_forward(params, blocks, x, pos_edges, neg_edges):
    a0, a1 = blocks
    c1, c2 = params["conv1"], params["conv2"]
    h1 = _ref_sage(a0, x, c1["w_neigh"], c1["w_self"], c1["bias"], True)
    h2 = _ref_sage(a1, h1, c2["w_neigh"], c2["w_self"], c2["bias"], False)
    return (_ref_pred(h2[pos_edges[0]], h2[pos_edges[1]], params["pred"]),
            _ref_pred(h2[neg_edges[0]], h2[neg_edges[1]], params["pred"]))


if __name__ == "__main__":
    in_feats, n_hidden = 16, 32
    n0, n1, n2 = 16, 12, 8           # input nodes, layer-1 dst, layer-2 dst
    e_pos, e_neg = 6, 12             # positive / negative edges

    key = jax.random.PRNGKey(0)
    k_par, k_feat, k_a0, k_a1, k_e = jax.random.split(key, 5)

    params = init_params(k_par, in_feats, n_hidden)
    input_feat = jax.random.normal(k_feat, (n0, in_feats), jnp.float32)
    a0 = jax.random.bernoulli(k_a0, 0.4, (n1, n0)).astype(jnp.float32)
    a1 = jax.random.bernoulli(k_a1, 0.4, (n2, n1)).astype(jnp.float32)

    ke1, ke2, ke3, ke4 = jax.random.split(k_e, 4)
    pos_edges = (jax.random.randint(ke1, (e_pos,), 0, n2),
                 jax.random.randint(ke2, (e_pos,), 0, n2))
    neg_edges = (jax.random.randint(ke3, (e_neg,), 0, n2),
                 jax.random.randint(ke4, (e_neg,), 0, n2))

    h_pos, h_neg = model_forward(params, (a0, a1), input_feat, pos_edges,
                                 neg_edges)
    jax.block_until_ready((h_pos, h_neg))
    assert h_pos.shape == (e_pos, 1) and h_neg.shape == (e_neg, 1)

    # ---- per-kernel checks (identical inputs -> tight tolerances) ----
    c1 = params["conv1"]
    h1_k = sage_conv(a0, input_feat, c1["w_neigh"], c1["w_self"], c1["bias"],
                     apply_relu=True)
    h1_r = _ref_sage(a0, input_feat, c1["w_neigh"], c1["w_self"], c1["bias"],
                     True)
    assert jnp.allclose(h1_k, h1_r, atol=2e-3, rtol=2e-3)

    c2 = params["conv2"]
    h2_k = sage_conv(a1, h1_k, c2["w_neigh"], c2["w_self"], c2["bias"],
                     apply_relu=False)
    s_all = jnp.concatenate([h2_k[pos_edges[0]], h2_k[neg_edges[0]]], axis=0)
    d_all = jnp.concatenate([h2_k[pos_edges[1]], h2_k[neg_edges[1]]], axis=0)
    pred_k = predictor(s_all, d_all, params["pred"])
    pred_r = _ref_pred(s_all, d_all, params["pred"])
    assert jnp.allclose(pred_k, pred_r, atol=1e-4, rtol=1e-4)

    # ---- end-to-end check (bf16 rounding of intermediates can differ by one
    #      ulp between paths, so tolerance is slightly looser) ----
    r_pos, r_neg = _ref_forward(params, (a0, a1), input_feat, pos_edges,
                                neg_edges)
    assert jnp.allclose(h_pos, r_pos, atol=2e-2, rtol=2e-2)
    assert jnp.allclose(h_neg, r_neg, atol=2e-2, rtol=2e-2)

    print("KERNEL_OK")
</pallas_src>

<mosaic_0001>
module attributes {stable_mosaic.version = 11 : i64} {
  func.func @sage_conv_kernel(%arg0: i32, %arg1: i32, %arg2: memref<16x128xbf16, #tpu.memory_space<vmem>>, %arg3: memref<128x128xbf16, #tpu.memory_space<vmem>>, %arg4: memref<16x128xbf16, #tpu.memory_space<vmem>>, %arg5: memref<128x128xf32, #tpu.memory_space<vmem>>, %arg6: memref<128x128xf32, #tpu.memory_space<vmem>>, %arg7: memref<1x128xf32, #tpu.memory_space<vmem>>, %arg8: memref<16x128xf32, #tpu.memory_space<vmem>>, %arg9: memref<16x128xf32, #tpu.memory_space<vmem>>, %arg10: memref<16x1xf32, #tpu.memory_space<vmem>>) attributes {dimension_semantics = [#tpu.dimension_semantics<parallel>, #tpu.dimension_semantics<arbitrary>], iteration_bounds = array<i64: 1, 1>, scalar_prefetch = 0 : i64, scratch_operands = 2 : i64, tpu.core_type = #tpu.core_type<tc>, window_params = [{transform_indices = @transform_0, window_bounds = array<i64: 16, 128>}, {transform_indices = @transform_1, window_bounds = array<i64: 128, 128>}, {transform_indices = @transform_2, window_bounds = array<i64: 16, 128>}, {pipeline_mode = #tpu.pipeline_mode<synchronous>, transform_indices = @transform_3, window_bounds = array<i64: 128, 128>}, {pipeline_mode = #tpu.pipeline_mode<synchronous>, transform_indices = @transform_4, window_bounds = array<i64: 128, 128>}, {pipeline_mode = #tpu.pipeline_mode<synchronous>, transform_indices = @transform_5, window_bounds = array<i64: 1, 128>}, {transform_indices = @transform_6, window_bounds = array<i64: 16, 128>}]} {
    %c0_i32 = arith.constant 0 : i32
    %0 = arith.cmpi eq, %arg1, %c0_i32 : i32
    %1 = arith.extui %0 : i1 to i32
    %c0_i32_0 = arith.constant 0 : i32
    %2 = arith.cmpi ne, %1, %c0_i32_0 : i32
    scf.if %2 {
      %cst_15 = arith.constant 0.000000e+00 : f32
      %18 = vector.broadcast %cst_15 : f32 to vector<16x128xf32>
      %c0_16 = arith.constant 0 : index
      %c0_17 = arith.constant 0 : index
      %19 = vector.load %arg9[%c0_16, %c0_17] : memref<16x128xf32, #tpu.memory_space<vmem>>, vector<16x128xf32>
      tpu.vector_store %arg9[%c0_16, %c0_17], %18 {strides = array<i32>} : memref<16x128xf32, #tpu.memory_space<vmem>>, vector<16x128xf32>,
      %cst_18 = arith.constant 0.000000e+00 : f32
      %20 = vector.broadcast %cst_18 : f32 to vector<16x1xf32>
      %c0_19 = arith.constant 0 : index
      %c0_20 = arith.constant 0 : index
      %21 = vector.load %arg10[%c0_19, %c0_20] : memref<16x1xf32, #tpu.memory_space<vmem>>, vector<16x1xf32>
      tpu.vector_store %arg10[%c0_19, %c0_20], %20 {strides = array<i32>} : memref<16x1xf32, #tpu.memory_space<vmem>>, vector<16x1xf32>,
    } else {
    }
    %c0 = arith.constant 0 : index
    %c0_1 = arith.constant 0 : index
    %3 = vector.load %arg2[%c0, %c0_1] : memref<16x128xbf16, #tpu.memory_space<vmem>>, vector<16x128xbf16>
    %c0_2 = arith.constant 0 : index
    %c0_3 = arith.constant 0 : index
    %4 = vector.load %arg9[%c0_2, %c0_3] : memref<16x128xf32, #tpu.memory_space<vmem>>, vector<16x128xf32>
    %c0_4 = arith.constant 0 : index
    %c0_5 = arith.constant 0 : index
    %5 = vector.load %arg3[%c0_4, %c0_5] : memref<128x128xbf16, #tpu.memory_space<vmem>>, vector<128x128xbf16>
    %cst = arith.constant dense<0.000000e+00> : vector<16x128xf32>
    %6 = tpu.matmul %3, %5, %cst {dimension_numbers = #tpu.dot_dimension_numbers<[1], [0], [0], [1], [0, 0, 1, 1], [], []>} : vector<16x128xbf16>, vector<128x128xbf16>, vector<16x128xf32> -> vector<16x128xf32>
    %7 = arith.addf %4, %6 : vector<16x128xf32>
    %c0_6 = arith.constant 0 : index
    %c0_7 = arith.constant 0 : index
    %8 = vector.load %arg9[%c0_6, %c0_7] : memref<16x128xf32, #tpu.memory_space<vmem>>, vector<16x128xf32>
    tpu.vector_store %arg9[%c0_6, %c0_7], %7 {strides = array<i32>} : memref<16x128xf32, #tpu.memory_space<vmem>>, vector<16x128xf32>,
    %c0_8 = arith.constant 0 : index
    %c0_9 = arith.constant 0 : index
    %9 = vector.load %arg10[%c0_8, %c0_9] : memref<16x1xf32, #tpu.memory_space<vmem>>, vector<16x1xf32>
    %10 = arith.extf %3 : vector<16x128xbf16> to vector<16x128xf32>
    %cst_10 = arith.constant dense<0.000000e+00> : vector<16xf32>
    %11 = vector.multi_reduction <add>, %10, %cst_10 [1] : vector<16x128xf32> to vector<16xf32>
    %12 = vector.shape_cast %11 : vector<16xf32> to vector<16x1xf32>
    %13 = arith.addf %9, %12 : vector<16x1xf32>
    %c0_11 = arith.constant 0 : index
    %c0_12 = arith.constant 0 : index
    %14 = vector.load %arg10[%c0_11, %c0_12] : memref<16x1xf32, #tpu.memory_space<vmem>>, vector<16x1xf32>
    tpu.vector_store %arg10[%c0_11, %c0_12], %13 {strides = array<i32>} : memref<16x1xf32, #tpu.memory_space<vmem>>, vector<16x1xf32>,
    %c0_i32_13 = arith.constant 0 : i32
    %15 = arith.cmpi eq, %arg1, %c0_i32_13 : i32
    %16 = arith.extui %15 : i1 to i32
    %c0_i32_14 = arith.constant 0 : i32
    %17 = arith.cmpi ne, %16, %c0_i32_14 : i32
    scf.if %17 {
      %c0_15 = arith.constant 0 : index
      %c0_16 = arith.constant 0 : index
      %18 = vector.load %arg10[%c0_15, %c0_16] : memref<16x1xf32, #tpu.memory_space<vmem>>, vector<16x1xf32>
      %cst_17 = arith.constant 1.000000e+00 : f32
      %19 = vector.broadcast %cst_17 : f32 to vector<16x1xf32>
      %20 = arith.maximumf %18, %19 : vector<16x1xf32>
      %cst_18 = arith.constant 1.000000e+00 : f32
      %21 = vector.broadcast %cst_18 : f32 to vector<16x1xf32>
      %22 = arith.divf %21, %20 : vector<16x1xf32>
      %c0_19 = arith.constant 0 : index
      %c0_20 = arith.constant 0 : index
      %23 = vector.load %arg9[%c0_19, %c0_20] : memref<16x128xf32, #tpu.memory_space<vmem>>, vector<16x128xf32>
      %24 = vector.broadcast %22 : vector<16x1xf32> to vector<16x128xf32>
      %25 = arith.mulf %23, %24 : vector<16x128xf32>
      %c0_21 = arith.constant 0 : index
      %c0_22 = arith.constant 0 : index
      %26 = vector.load %arg5[%c0_21, %c0_22] : memref<128x128xf32, #tpu.memory_space<vmem>>, vector<128x128xf32>
      %cst_23 = arith.constant dense<0.000000e+00> : vector<16x128xf32>
      %27 = tpu.matmul %25, %26, %cst_23 {dimension_numbers = #tpu.dot_dimension_numbers<[1], [0], [0], [1], [0, 0, 1, 1], [], []>} : vector<16x128xf32>, vector<128x128xf32>, vector<16x128xf32> -> vector<16x128xf32>
      %c0_24 = arith.constant 0 : index
      %c0_25 = arith.constant 0 : index
      %28 = vector.load %arg4[%c0_24, %c0_25] : memref<16x128xbf16, #tpu.memory_space<vmem>>, vector<16x128xbf16>
      %29 = arith.extf %28 : vector<16x128xbf16> to vector<16x128xf32>
      %c0_26 = arith.constant 0 : index
      %c0_27 = arith.constant 0 : index
      %30 = vector.load %arg6[%c0_26, %c0_27] : memref<128x128xf32, #tpu.memory_space<vmem>>, vector<128x128xf32>
      %cst_28 = arith.constant dense<0.000000e+00> : vector<16x128xf32>
      %31 = tpu.matmul %29, %30, %cst_28 {dimension_numbers = #tpu.dot_dimension_numbers<[1], [0], [0], [1], [0, 0, 1, 1], [], []>} : vector<16x128xf32>, vector<128x128xf32>, vector<16x128xf32> -> vector<16x128xf32>
      %32 = arith.addf %27, %31 : vector<16x128xf32>
      %c0_29 = arith.constant 0 : index
      %c0_30 = arith.constant 0 : index
      %33 = vector.load %arg7[%c0_29, %c0_30] : memref<1x128xf32, #tpu.memory_space<vmem>>, vector<1x128xf32>
      %34 = vector.broadcast %33 : vector<1x128xf32> to vector<16x128xf32>
      %35 = arith.addf %32, %34 : vector<16x128xf32>
      %cst_31 = arith.constant 0.000000e+00 : f32
      %36 = vector.broadcast %cst_31 : f32 to vector<16x128xf32>
      %37 = arith.maximumf %35, %36 : vector<16x128xf32>
      %c0_32 = arith.constant 0 : index
      %c0_33 = arith.constant 0 : index
      %38 = vector.load %arg8[%c0_32, %c0_33] : memref<16x128xf32, #tpu.memory_space<vmem>>, vector<16x128xf32>
      tpu.vector_store %arg8[%c0_32, %c0_33], %37 {strides = array<i32>} : memref<16x128xf32, #tpu.memory_space<vmem>>, vector<16x128xf32>,
    } else {
    }
    return
  }
  func.func @transform_0(%arg0: i32, %arg1: i32) -> (i32, i32) {
    %c0_i32 = arith.constant 0 : i32
    return %arg0, %arg1 : i32, i32
  }
  func.func @transform_1(%arg0: i32, %arg1: i32) -> (i32, i32) {
    %c0_i32 = arith.constant 0 : i32
    %c0_i32_0 = arith.constant 0 : i32
    return %arg1, %c0_i32 : i32, i32
  }
  func.func @transform_2(%arg0: i32, %arg1: i32) -> (i32, i32) {
    %c0_i32 = arith.constant 0 : i32
    %c0_i32_0 = arith.constant 0 : i32
    return %arg0, %c0_i32 : i32, i32
  }
  func.func @transform_3(%arg0: i32, %arg1: i32) -> (i32, i32) {
    %c0_i32 = arith.constant 0 : i32
    %c0_i32_0 = arith.constant 0 : i32
    %c0_i32_1 = arith.constant 0 : i32
    return %c0_i32, %c0_i32_0 : i32, i32
  }
  func.func @transform_4(%arg0: i32, %arg1: i32) -> (i32, i32) {
    %c0_i32 = arith.constant 0 : i32
    %c0_i32_0 = arith.constant 0 : i32
    %c0_i32_1 = arith.constant 0 : i32
    return %c0_i32, %c0_i32_0 : i32, i32
  }
  func.func @transform_5(%arg0: i32, %arg1: i32) -> (i32, i32) {
    %c0_i32 = arith.constant 0 : i32
    %c0_i32_0 = arith.constant 0 : i32
    %c0_i32_1 = arith.constant 0 : i32
    return %c0_i32, %c0_i32_0 : i32, i32
  }
  func.func @transform_6(%arg0: i32, %arg1: i32) -> (i32, i32) {
    %c0_i32 = arith.constant 0 : i32
    %c0_i32_0 = arith.constant 0 : i32
    return %arg0, %c0_i32 : i32, i32
  }
}

</mosaic_0001>

<bundles_post_ra>
// kernel: tpu_custom_call.1
= control target key start
LH: loop header
LB: loop body
LE: loop exit
PB: predicated region body
PF: predicated region fallthrough
CT: control target
= control target key end

     0   :  { %11 = vsyncpa [#allocation5], 0  ;;  %s681_s0 = inlined_call_operand.hbm [shape: bf16[16,128], index: 0, kind: input, shape index: {}]   ;;  %s682_s1 = inlined_call_operand.hbm [shape: bf16[128,128], index: 1, kind: input, shape index: {}]   ;;  %s683_s2 = inlined_call_operand.hbm [shape: bf16[128,128], index: 2, kind: input, shape index: {}]   ;;  %s684_s3 = inlined_call_operand.hbm [shape: f32[128,128], index: 3, kind: input, shape index: {}]   ;;  %s685_s4 = inlined_call_operand.hbm [shape: f32[128,128], index: 4, kind: input, shape index: {}]   ;;  %s686_s5 = inlined_call_operand.vmem [shape: f32[1,128], index: 5, kind: input, shape index: {}]   ;;  %s687_s6 = inlined_call_operand.hbm [shape: f32[16,128], index: 6, kind: output, shape index: {}]  }
   0x1   :  { %12 = vsyncpa [#allocation8], 0 }
   0x2   :  { %13 = vsyncpa [#allocation11], 0 }
   0x3   :  { %14 = vsyncpa [#allocation6], 0  ;;  %s32_s23 = sshll.u32 %s682_s1, 4  ;;  %s600_s24 = smov [#allocation7]   ;;  %s33_s23 = int_to_ptr.hbm [resolvable:$true] %s32_s23 }
   0x4   :  { %s34_s25 = sshll.u32 %s600_s24, 4  ;;  %s58_s28 = sshll.u32 %s684_s3, 4  ;;  %s35_s25 = int_to_ptr.vmem [resolvable:$true] %s34_s25  ;;  %s59_s28 = int_to_ptr.hbm [resolvable:$true] %s58_s28 }
   0x5   :  { %s601_s29 = smov 64   ;;  %s602_s30 = smov 4  }
   0x6   :  { %40 = dma.hbm_to_vmem [thread:$0]  %s33_s23, 1024, %s35_s25, [#allocation8], %s601_s29, %s601_s29, %s602_s30  }
   0x7   :  { %s603_s7 = smov [#allocation10]   ;;  %s604_s9 = smov 128  }
   0x8   :  { %s60_s8 = sshll.u32 %s603_s7, 4  ;;  %s605_s10 = smov 8   ;;  %s61_s8 = int_to_ptr.vmem [resolvable:$true] %s60_s8 }
   0x9   :  { %66 = dma.hbm_to_vmem [thread:$0]  %s59_s28, 2048, %s61_s8, [#allocation11], %s604_s9, %s604_s9, %s605_s10  }
   0xa   :  { %s19_s12 = sshll.u32 %s681_s0, 4  ;;  %s606_s13 = smov [#allocation4]   ;;  %s20_s12 = int_to_ptr.hbm [resolvable:$true] %s19_s12 }
   0xb   :  { %s21_s3 = sshll.u32 %s606_s13, 4  ;;  %s45_s16 = sshll.u32 %s683_s2, 4  ;;  %s22_s3 = int_to_ptr.vmem [resolvable:$true] %s21_s3  ;;  %s46_s16 = int_to_ptr.hbm [resolvable:$true] %s45_s16 }
   0xc   :  { %27 = dma.hbm_to_vmem [thread:$0]  %s20_s12, 128, %s22_s3, [#allocation5], %s601_s29, %s601_s29, %s602_s30  }
   0xd   :  { %s607_s17 = smov [#allocation9]   ;;  %s71_s21 = sshll.u32 %s685_s4, 4  ;;  %s72_s21 = int_to_ptr.hbm [resolvable:$true] %s71_s21 }
   0xe   :  { %s47_s18 = sshll.u32 %s607_s17, 4  ;;  %s608_s0 = smov [#allocation12]   ;;  %s48_s18 = int_to_ptr.vmem [resolvable:$true] %s47_s18 }
   0xf   :  { %53 = dma.hbm_to_vmem [thread:$0]  %s46_s16, 128, %s48_s18, [#allocation8], %s601_s29, %s601_s29, %s602_s30  }
  0x10   :  { %s73_s22 = sshll.u32 %s608_s0, 4  ;;  %s74_s22 = int_to_ptr.vmem [resolvable:$true] %s73_s22 }
  0x11   :  { %79 = dma.hbm_to_vmem [thread:$0]  %s72_s21, 2048, %s74_s22, [#allocation11], %s604_s9, %s604_s9, %s605_s10  }
  0x12   :  { %592 = dma.done.wait [#allocation5], 128  }
  0x13   :  { %593 = vsyncadd [#allocation5], 4294967168 }
  0x14   :  { %594 = dma.done.wait [#allocation8], 1152  }
  0x15   :  { %595 = vsyncadd [#allocation8], 4294966144 }
  0x16   :  { %596 = dma.done.wait [#allocation11], 4096  }
  0x17   :  { %597 = vsyncadd [#allocation11], 4294963200  ;;  %vm108_vm0 = vcmask 7168   ;;  %v609_v0 = vmov 0.0   ;;  %v111_v1 = vld [vmem:[#allocation4] sm:$0xff]   ;;  %v423_v4 = vld [vmem:[#allocation7 + $0x30] sm:$0xff] }
  0x18   :  { %109 = vst.msk [vmem:[#allocation3] sm:$0xff] %vm108_vm0, %v609_v0  ;;  %v424_v2 = vld [vmem:[#allocation7 + $0x38] sm:$0xff]  ;;  %v205_v3 = vunpack.c.l.bf16 %v111_v1  ;;  %v422_v5 = vld [vmem:[#allocation7 + $0x28] sm:$0xff]  ;;  %v206_v6 = vunpack.c.h.bf16 %v111_v1  ;;  %v421_v7 = vld [vmem:[#allocation7 + $0x20] sm:$0xff]  ;;  %v610_v13 = vmov 0   ;;  %s611_s23 = smov [#allocation13]  }
  0x19   :  { %110 = vst.msk [vmem:[#allocation3 + $0x8] sm:$0xff] %vm108_vm0, %v609_v0  ;;  %185 = vmatpush.bf16.msra.mxu0 %v424_v2  ;;  %v420_v8 = vld [vmem:[#allocation7 + $0x18] sm:$0xff]  ;;  %v419_v9 = vld [vmem:[#allocation7 + $0x10] sm:$0xff]  ;;  %v418_v10 = vld [vmem:[#allocation7 + $0x8] sm:$0xff]  ;;  %441 = vset.pattern.permute.xlu1 %v610_v13  ;;  %s363_s24 = sshll.u32 %s611_s23, 4  ;;  %s365_s27 = sshll.u32 %s687_s6, 4  ;;  %s364_s24 = int_to_ptr.vmem [resolvable:$true] %s363_s24  ;;  %s366_s27 = int_to_ptr.hbm [resolvable:$true] %s365_s27 }
  0x1a   :  { %207 = vadd.xlane.f32.xlu0 %v205_v3  ;;  %v417_v11 = vld [vmem:[#allocation7] sm:$0xff]  ;;  %v416_v12 = vld [vmem:[#allocation4] sm:$0xff]  ;;  %v280_v23 = vld [vmem:[#allocation10 + $0x68] sm:$0xff] }
  0x1b   :  { %442 = vset.pattern.permute.xlu0 %v610_v13  ;;  %v282_v18 = vld [vmem:[#allocation10 + $0x78] sm:$0xff]  ;;  %v281_v19 = vld [vmem:[#allocation10 + $0x70] sm:$0xff]  ;;  %v300_v25 = vld [vmem:[#allocation12 + $0x68] sm:$0xff] }
  0x1c   :  { %326 = vmatpush.msra.mxu2 %v282_v18  ;;  %v302_v20 = vld [vmem:[#allocation12 + $0x78] sm:$0xff]  ;;  %v301_v21 = vld [vmem:[#allocation12 + $0x70] sm:$0xff]  ;;  %v279_v27 = vld [vmem:[#allocation10 + $0x60] sm:$0xff] }
  0x1d   :  { %186 = vmatpush.bf16.msra.mxu0 %v423_v4  ;;  %303 = vmatpush.msra.mxu1 %v302_v20  ;;  %v299_v29 = vld [vmem:[#allocation12 + $0x60] sm:$0xff]  ;;  %v278_v30 = vld [vmem:[#allocation10 + $0x58] sm:$0xff]  ;;  %v277_v32 = vld [vmem:[#allocation10 + $0x50] sm:$0xff] }
  0x1e   :  { %327 = vmatpush.msra.mxu2 %v281_v19  ;;  %v298_v31 = vld [vmem:[#allocation12 + $0x58] sm:$0xff]  ;;  %v297_v33 = vld [vmem:[#allocation12 + $0x50] sm:$0xff]  ;;  %v276_v34 = vld [vmem:[#allocation10 + $0x48] sm:$0xff] }
  0x1f   :  { %v203_v14 = vld [vmem:[#allocation3] sm:$0xff]  ;;  %304 = vmatpush.msra.mxu1 %v301_v21  ;;  %v296_v35 = vld [vmem:[#allocation12 + $0x48] sm:$0xff]  ;;  %v274_v41 = vld [vmem:[#allocation10 + $0x38] sm:$0xff] }
  0x20   :  { %v204_v17 = vld [vmem:[#allocation3 + $0x8] sm:$0xff]  ;;  %328 = vmatpush.msra.mxu2 %v280_v23  ;;  %v275_v37 = vld [vmem:[#allocation10 + $0x40] sm:$0xff]  ;;  %v273_v43 = vld [vmem:[#allocation10 + $0x30] sm:$0xff] }
  0x21   :  { %187 = vmatpush.bf16.msra.mxu0 %v422_v5  ;;  %305 = vmatpush.msra.mxu1 %v300_v25  ;;  %v295_v61 = vld [vmem:[#allocation12 + $0x40] sm:$0xff]  ;;  %v272_v62 = vld [vmem:[#allocation10 + $0x28] sm:$0xff]  ;;  %v294_v63 = vld [vmem:[#allocation12 + $0x38] sm:$0xff] }
  0x22   :  { %209 = vadd.xlane.f32.xlu0 %v206_v6  ;;  %329 = vmatpush.msra.mxu2 %v279_v27  ;;  %v271_v0 = vld [vmem:[#allocation10 + $0x20] sm:$0xff]  ;;  %v293_v1 = vld [vmem:[#allocation12 + $0x30] sm:$0xff]  ;;  %v270_v2 = vld [vmem:[#allocation10 + $0x18] sm:$0xff] }
  0x23   :  { %306 = vmatpush.msra.mxu1 %v299_v29  ;;  %v292_v3 = vld [vmem:[#allocation12 + $0x28] sm:$0xff]  ;;  %v269_v4 = vld [vmem:[#allocation10 + $0x10] sm:$0xff]  ;;  %v291_v5 = vld [vmem:[#allocation12 + $0x20] sm:$0xff] }
  0x24   :  { %330 = vmatpush.msra.mxu2 %v278_v30  ;;  %v268_v6 = vld [vmem:[#allocation10 + $0x8] sm:$0xff] }
  0x25   :  { %188 = vmatpush.bf16.msra.mxu0 %v421_v7  ;;  %307 = vmatpush.msra.mxu1 %v298_v31  ;;  %v290_v7 = vld [vmem:[#allocation12 + $0x18] sm:$0xff] }
  0x26   :  { %331 = vmatpush.msra.mxu2 %v277_v32 }
  0x27   :  { %308 = vmatpush.msra.mxu1 %v297_v33 }
  0x28   :  { %332 = vmatpush.msra.mxu2 %v276_v34 }
  0x29   :  { %189 = vmatpush.bf16.msra.mxu0 %v420_v8  ;;  %309 = vmatpush.msra.mxu1 %v296_v35  ;;  %v267_v8 = vld [vmem:[#allocation10] sm:$0xff] }
  0x2a   :  { %333 = vmatpush.msra.mxu2 %v275_v37 }
  0x2b   :  { %310 = vmatpush.msra.mxu1 %v295_v61 }
  0x2c   :  { %334 = vmatpush.msra.mxu2 %v274_v41 }
  0x2d   :  { %190 = vmatpush.bf16.msra.mxu0 %v419_v9  ;;  %311 = vmatpush.msra.mxu1 %v294_v63  ;;  %v289_v9 = vld [vmem:[#allocation12 + $0x10] sm:$0xff] }
  0x2e   :  { %335 = vmatpush.msra.mxu2 %v273_v43 }
  0x2f   :  { %312 = vmatpush.msra.mxu1 %v293_v1 }
  0x30   :  { %336 = vmatpush.msra.mxu2 %v272_v62 }
  0x31   :  { %191 = vmatpush.bf16.msra.mxu0 %v418_v10  ;;  %313 = vmatpush.msra.mxu1 %v292_v3  ;;  %v288_v10 = vld [vmem:[#allocation12 + $0x8] sm:$0xff] }
  0x32   :  { %337 = vmatpush.msra.mxu2 %v271_v0 }
  0x33   :  { %314 = vmatpush.msra.mxu1 %v291_v5 }
  0x34   :  { %338 = vmatpush.msra.mxu2 %v270_v2 }
  0x35   :  { %192 = vmatpush.bf16.msra.mxu0 %v417_v11  ;;  %315 = vmatpush.msra.mxu1 %v290_v7  ;;  %v287_v11 = vld [vmem:[#allocation12] sm:$0xff] }
  0x36   :  { %339 = vmatpush.msra.mxu2 %v269_v4 }
  0x37   :  { %316 = vmatpush.msra.mxu1 %v289_v9 }
  0x38   :  { %193 = vmatmul.bf16.vlgmr.msra.gmra.mxu0 %v416_v12  ;;  %340 = vmatpush.msra.mxu2 %v268_v6  ;;  %v426_v12 = vld [vmem:[#allocation9] sm:$0xff]  }
  0x39   :  { %317 = vmatpush.msra.mxu1 %v288_v10  ;;  %v427_v13 = vunpack.c.l.bf16 %v426_v12 }
  0x3a   :  { %341 = vmatpush.msra.mxu2 %v267_v8 }
  0x3b   :  { %318 = vmatpush.msra.mxu1 %v287_v11 }
  0x3c   :  { %319 = vmatmul.f32.vlgmr.msra.gmra.mxu1 %v427_v13 }
  0x8d   :  { %v208_v15 = vpop.xlane.xlu0 %207 }
  0x8e   :  { %v211_v16 = vadd.f32 %v208_v15, %v203_v14  ;;  %v428_v14 = vunpack.c.h.bf16 %v426_v12 }
  0x90   :  { %214 = vst.msk [vmem:[#allocation3] sm:$0xff] %vm108_vm0, %v211_v16  ;;  %322 = vmatmul.f32.gmra.mxu1 %v428_v14 }
  0x95   :  { %v210_v22 = vpop.xlane.xlu0 %209 }
  0x96   :  { %v212_v24 = vadd.f32 %v210_v22, %v204_v17  ;;  %v443_v22 = vld [vmem:[%s686_s5] ss:$0 sm:$0xff] }
  0x97   :  { %v219_v26 = vld [vmem:[#allocation3] sm:$0xff] }
  0x98   :  { %215 = vst.msk [vmem:[#allocation3 + $0x8] sm:$0xff] %vm108_vm0, %v212_v24  ;;  %v221_v28 = vmax.f32 %v219_v26, 1.0 }
  0x9a   :  { %444 = vrcp.f32 %v221_v28  ;;  %v234_v44 = vand.u32 2147483648, %v221_v28  ;;  %v232_v46 = vand.u32 2147483647, %v221_v28  ;;  %vm228_vm2 = vweird.f32 %v221_v28 }
  0x9c   :  { %v235_v49 = vor.u32 1.1754944e-38, %v234_v44  ;;  %vm233_vm4 = vcmp.eq.f32.partialorder %v232_v46, 8.507059e+37 }
  0x9f   :  { %v220_v36 = vld [vmem:[#allocation3 + $0x8] sm:$0xff] }
  0xa0   :  { %v445_v38 = vpop.eup %444  ;;  %v222_v39 = vmax.f32 %v220_v36, 1.0 }
  0xa1   :  { %v224_v40 = vmul.f32 %v445_v38, %v221_v28  ;;  %vm229_vm1 = vweird.f32 %v445_v38 }
  0xa2   :  { %446 = vrcp.f32 %v222_v39  ;;  %vm230_vm3 = vmor %vm228_vm2, %vm229_vm1  ;;  %v249_v54 = vand.u32 2147483648, %v222_v39  ;;  %v247_v56 = vand.u32 2147483647, %v222_v39  ;;  %vm243_vm6 = vweird.f32 %v222_v39 }
  0xa3   :  { %v225_v42 = vsub.f32 1.0, %v224_v40 }
  0xa4   :  { %v250_v58 = vor.u32 1.1754944e-38, %v249_v54  ;;  %vm248_vm8 = vcmp.eq.f32.partialorder %v247_v56, 8.507059e+37 }
  0xa5   :  { %v226_v45 = vmul.f32 %v445_v38, %v225_v42 }
  0xa7   :  { %v227_v47 = vadd.f32 %v445_v38, %v226_v45 }
  0xa8   :  { %v447_v48 = vpop.eup %446 }
  0xa9   :  { %v231_v50 = vsel %vm230_vm3, %v445_v38, %v227_v47  ;;  %v239_v51 = vmul.f32 %v447_v48, %v222_v39  ;;  %vm244_vm5 = vweird.f32 %v447_v48 }
  0xaa   :  { %v236_v52 = vsel %vm233_vm4, %v235_v49, %v231_v50  ;;  %vm245_vm7 = vmor %vm243_vm6, %vm244_vm5 }
  0xab   :  { %257 = vperm.xlu1 %441, %v236_v52   ;;  %v240_v53 = vsub.f32 1.0, %v239_v51 }
  0xad   :  { %v241_v55 = vmul.f32 %v447_v48, %v240_v53 }
  0xaf   :  { %v242_v57 = vadd.f32 %v447_v48, %v241_v55 }
  0xb1   :  { %v246_v59 = vsel %vm245_vm7, %v447_v48, %v242_v57 }
  0xb2   :  { %v251_v60 = vsel %vm248_vm8, %v250_v58, %v246_v59 }
  0xb3   :  { %262 = vperm.xlu1 %441, %v251_v60  }
  0xb5   :  { %v194_v15 = vpop.f32.mrf.mxu0 }
  0xb9   :  { %v320_v21 = vpop.f32.mrf.mxu1 }
  0xbd   :  { %v196_v18 = vpop.f32.mrf.mxu0 }
 0x10d   :  { %v323_v27 = vpop.f32.mrf.mxu1 }
 0x11d   :  { %v258_v16 = vpop.permute.xlu1 %257 }
 0x11e   :  { %v265_v17 = vmul.f32 %v258_v16, %v194_v15 }
 0x120   :  { %342 = vmatmul.f32.vlgmr.msra.gmra.mxu2 %v265_v17 }
 0x125   :  { %v263_v19 = vpop.permute.xlu1 %262 }
 0x126   :  { %v266_v20 = vmul.f32 %v263_v19, %v196_v18 }
 0x128   :  { %345 = vmatmul.f32.gmra.mxu2 %v266_v20 }
 0x1a3   :  { %v343_v23 = vpop.f32.mrf.mxu2 }
 0x1a4   :  { %v344_v24 = vadd.f32 %v343_v23, %v320_v21 }
 0x1a6   :  { %v353_v25 = vadd.f32 %v443_v22, %v344_v24 }
 0x1a8   :  { %v355_v26 = vmax.f32 %v353_v25, 0.0 }
 0x1aa   :  { %357 = vst [vmem:[#allocation13] sm:$0xff] %v355_v26 }
 0x1ab   :  { %v346_v28 = vpop.f32.mrf.mxu2 }
 0x1ac   :  { %v347_v29 = vadd.f32 %v346_v28, %v323_v27 }
 0x1ae   :  { %v354_v30 = vadd.f32 %v443_v22, %v347_v29 }
 0x1b0   :  { %v356_v31 = vmax.f32 %v354_v30, 0.0 }
 0x1b2   :  { %358 = vst [vmem:[#allocation13 + $0x8] sm:$0xff] %v356_v31 }
 0x1b3   :  { %371 = dma.vmem_to_hbm [thread:$0]  %s364_s24, 256, %s366_s27, [#allocation6], %s604_s9, %s604_s9, %s605_s10  }
 0x1b4   :  { %598 = dma.done.wait [#allocation6], 256  }
 0x1b5   :  { %599 = vsyncadd [#allocation6], 4294967040 }
 0x1b6   :  { %376 = vsyncpa [#allocation5], 1 }
 0x1b7   :  { %377 = vsyncpa [#allocation8], 1 }
 0x1b8   :  { %378 = vsyncpa [#allocation11], 1 }
 0x1b9   :  { %379 = vsyncpa [#allocation6], 1 }

</bundles_post_ra>
